<compile_context>
chip_gen: v5e
topology: v5e:2x2
jax: 0.10.0
libtpu: 0.0.40
codegen_flags: <defaults>
</compile_context>

<pallas_src>
import functools
import math

import jax
import jax.numpy as jnp
from jax.experimental import pallas as pl
from jax.experimental.pallas import tpu as pltpu


# ----------------------------- kernel --------------------------------------


def _self_attention_kernel(bias_ref, v_ref, k_ref, q_ref,
                           wv_ref, wk_ref, wq_ref, wfc_ref, bfc_ref,
                           o_ref, *, heads, head_dim, scale):
    # Batched, lane-dense per-head projections:
    # (L, E) @ blockdiag(W^T) -> (L, E)   (heads projected "in place").
    v_p = jnp.dot(v_ref[0], wv_ref[...], preferred_element_type=jnp.float32)
    k_p = jnp.dot(k_ref[0], wk_ref[...], preferred_element_type=jnp.float32)
    # Fold the 1/sqrt(embed_size) softmax scale into q once (Q*D elements).
    q_p = (jnp.dot(q_ref[0], wq_ref[...], preferred_element_type=jnp.float32)
           * jnp.float32(scale))

    head_outs = []
    for h in range(heads):                      # static unroll, H is small
        lo = h * head_dim
        qh = q_p[:, lo:lo + head_dim]           # (Q, D)
        kh = k_p[:, lo:lo + head_dim]           # (K, D)
        vh = v_p[:, lo:lo + head_dim]           # (K, D)

        # energy: (Q, K) -- contract last dims, no in-kernel transpose.
        energy = jax.lax.dot_general(
            qh, kh, (((1,), (1,)), ((), ())),
            preferred_element_type=jnp.float32)

        # additive mask bias (0 keep / -1e20 masked), applied before softmax
        energy = energy + bias_ref[0, h]
        energy = energy - jnp.max(energy, axis=-1, keepdims=True)
        p = jnp.exp(energy)
        inv = pl.reciprocal(jnp.sum(p, axis=-1, keepdims=True), approx=True)
        attn = p * inv

        head_outs.append(
            jnp.dot(attn, vh, preferred_element_type=jnp.float32))   # (Q, D)

    concat = jnp.concatenate(head_outs, axis=-1)                     # (Q, E)

    # fc_out fused in the same kernel: x @ W_fc^T + b  (lane-dense store).
    o_ref[0] = (jnp.dot(concat, wfc_ref[...],
                        preferred_element_type=jnp.float32)
                + bfc_ref[...])


# ----------------------------- wrapper -------------------------------------


def self_attention_pallas(values, keys, quaries, mask, params,
                          embed_size, heads):
    """values/keys: (N, Lk, E); quaries: (N, Q, E); mask: (N, H, Q, Lk)."""
    N, q_len, _ = quaries.shape
    kv_len = keys.shape[1]
    head_dim = embed_size // heads

    # Host-side (once-per-weights) prep: pre-transpose and pack the per-head
    # weights as block-diagonal (E, E) matrices so each projection becomes a
    # single lane-dense matmul inside the kernel.
    eye_h = jnp.eye(heads, dtype=jnp.float32)
    wv_bd = jnp.kron(eye_h, params["wv"].T)
    wk_bd = jnp.kron(eye_h, params["wk"].T)
    wq_bd = jnp.kron(eye_h, params["wq"].T)
    wfc_t = params["w_fc"].T
    b_fc = params["b_fc"].reshape(1, embed_size)

    # Additive mask bias: 0 where kept, -1e20 where masked (matches
    # masked_fill(-1e20) semantics after softmax).
    bias = jnp.where(mask == 0, jnp.float32(-1e20), jnp.float32(0.0))

    kernel = functools.partial(
        _self_attention_kernel, heads=heads, head_dim=head_dim,
        scale=1.0 / math.sqrt(embed_size))

    return pl.pallas_call(
        kernel,
        out_shape=jax.ShapeDtypeStruct((N, q_len, embed_size), jnp.float32),
        grid_spec=pltpu.PrefetchScalarGridSpec(
            num_scalar_prefetch=0,
            grid=(N,),
            in_specs=[
                pl.BlockSpec((1, heads, q_len, kv_len),
                             lambda n: (n, 0, 0, 0)),                  # bias
                pl.BlockSpec((1, kv_len, embed_size), lambda n: (n, 0, 0)),  # v
                pl.BlockSpec((1, kv_len, embed_size), lambda n: (n, 0, 0)),  # k
                pl.BlockSpec((1, q_len, embed_size), lambda n: (n, 0, 0)),   # q
                pl.BlockSpec((embed_size, embed_size), lambda n: (0, 0)),    # Wv^T (blockdiag)
                pl.BlockSpec((embed_size, embed_size), lambda n: (0, 0)),    # Wk^T (blockdiag)
                pl.BlockSpec((embed_size, embed_size), lambda n: (0, 0)),    # Wq^T (blockdiag)
                pl.BlockSpec((embed_size, embed_size), lambda n: (0, 0)),    # W_fc^T
                pl.BlockSpec((1, embed_size), lambda n: (0, 0)),             # b_fc
            ],
            out_specs=pl.BlockSpec((1, q_len, embed_size),
                                   lambda n: (n, 0, 0)),
        ),
        compiler_params=pltpu.CompilerParams(
            dimension_semantics=("parallel",)),
    )(bias, values, keys, quaries, wv_bd, wk_bd, wq_bd, wfc_t, b_fc)


# --------------------------- pure-JAX reference -----------------------------


def self_attention_ref(values, keys, quaries, mask, params, embed_size, heads):
    N, q_len, _ = quaries.shape
    kv_len = keys.shape[1]
    D = embed_size // heads
    v = values.reshape(N, kv_len, heads, D) @ params["wv"].T
    k = keys.reshape(N, kv_len, heads, D) @ params["wk"].T
    q = quaries.reshape(N, q_len, heads, D) @ params["wq"].T
    energy = jnp.einsum("nqhd,nkhd->nhqk", q, k)
    energy = jnp.where(mask == 0, -1e20, energy)
    attn = jax.nn.softmax(energy / math.sqrt(embed_size), axis=3)
    out = jnp.einsum("nhql,nlhd->nqhd", attn, v).reshape(N, q_len, embed_size)
    return out @ params["w_fc"].T + params["b_fc"][0]


# ----------------------------------- main -----------------------------------


if __name__ == "__main__":
    embed_size, heads = 32, 4
    head_dim = embed_size // heads
    N, q_len, kv_len = 2, 8, 16

    key = jax.random.PRNGKey(0)
    ks = jax.random.split(key, 8)

    # deterministic parameter init (synthetic, PyTorch-like scale 1/sqrt(fan_in))
    bound_h = 1.0 / math.sqrt(head_dim)
    bound_e = 1.0 / math.sqrt(embed_size)
    params = {
        "wv": jax.random.uniform(ks[0], (head_dim, head_dim), jnp.float32, -bound_h, bound_h),
        "wk": jax.random.uniform(ks[1], (head_dim, head_dim), jnp.float32, -bound_h, bound_h),
        "wq": jax.random.uniform(ks[2], (head_dim, head_dim), jnp.float32, -bound_h, bound_h),
        "w_fc": jax.random.uniform(ks[3], (embed_size, embed_size), jnp.float32, -bound_e, bound_e),
        "b_fc": jax.random.uniform(ks[4], (1, embed_size), jnp.float32, -bound_e, bound_e),
    }

    values = jax.random.normal(ks[5], (N, kv_len, embed_size), jnp.float32)
    keys_x = jax.random.normal(ks[6], (N, kv_len, embed_size), jnp.float32)
    quaries = jax.random.normal(ks[7], (N, q_len, embed_size), jnp.float32)

    # mask: (N, H, Q, K), 1 = keep, 0 = masked (block the upper-right half)
    q_ids = jnp.arange(q_len)[:, None]
    k_ids = jnp.arange(kv_len)[None, :]
    mask = (k_ids <= (q_ids * 2 + 1)).astype(jnp.int32)
    mask = jnp.broadcast_to(mask, (N, heads, q_len, kv_len))

    out = self_attention_pallas(values, keys_x, quaries, mask, params,
                                embed_size, heads)
    out = jax.block_until_ready(out)

    ref = self_attention_ref(values, keys_x, quaries, mask, params,
                             embed_size, heads)
    assert out.shape == (N, q_len, embed_size)
    # Tolerance relaxed vs 1e-4 because the softmax denominator uses the EUP
    # approximate reciprocal (relative error ~2^-12); everything else is f32.
    assert jnp.allclose(out, ref, atol=2e-3, rtol=2e-3), (
        float(jnp.max(jnp.abs(out - ref))))

    print("KERNEL_OK")
</pallas_src>

<mosaic_0001>
module attributes {stable_mosaic.version = 11 : i64} {
  func.func @_self_attention_kernel(%arg0: i32, %arg1: memref<1x4x8x16xf32, #tpu.memory_space<vmem>>, %arg2: memref<1x16x32xf32, #tpu.memory_space<vmem>>, %arg3: memref<1x16x32xf32, #tpu.memory_space<vmem>>, %arg4: memref<1x8x32xf32, #tpu.memory_space<vmem>>, %arg5: memref<32x32xf32, #tpu.memory_space<vmem>>, %arg6: memref<32x32xf32, #tpu.memory_space<vmem>>, %arg7: memref<32x32xf32, #tpu.memory_space<vmem>>, %arg8: memref<32x32xf32, #tpu.memory_space<vmem>>, %arg9: memref<1x32xf32, #tpu.memory_space<vmem>>, %arg10: memref<1x8x32xf32, #tpu.memory_space<vmem>>) attributes {dimension_semantics = [#tpu.dimension_semantics<parallel>], iteration_bounds = array<i64: 2>, scalar_prefetch = 0 : i64, scratch_operands = 0 : i64, tpu.core_type = #tpu.core_type<tc>, window_params = [{transform_indices = @transform_0, window_bounds = array<i64: 1, 4, 8, 16>}, {transform_indices = @transform_1, window_bounds = array<i64: 1, 16, 32>}, {transform_indices = @transform_2, window_bounds = array<i64: 1, 16, 32>}, {transform_indices = @transform_3, window_bounds = array<i64: 1, 8, 32>}, {pipeline_mode = #tpu.pipeline_mode<synchronous>, transform_indices = @transform_4, window_bounds = array<i64: 32, 32>}, {pipeline_mode = #tpu.pipeline_mode<synchronous>, transform_indices = @transform_5, window_bounds = array<i64: 32, 32>}, {pipeline_mode = #tpu.pipeline_mode<synchronous>, transform_indices = @transform_6, window_bounds = array<i64: 32, 32>}, {pipeline_mode = #tpu.pipeline_mode<synchronous>, transform_indices = @transform_7, window_bounds = array<i64: 32, 32>}, {pipeline_mode = #tpu.pipeline_mode<synchronous>, transform_indices = @transform_8, window_bounds = array<i64: 1, 32>}, {transform_indices = @transform_9, window_bounds = array<i64: 1, 8, 32>}]} {
    %c0 = arith.constant 0 : index
    %c0_0 = arith.constant 0 : index
    %c0_1 = arith.constant 0 : index
    %0 = vector.load %arg2[%c0, %c0_0, %c0_1] : memref<1x16x32xf32, #tpu.memory_space<vmem>>, vector<1x16x32xf32>
    %1 = vector.shape_cast %0 : vector<1x16x32xf32> to vector<16x32xf32>
    %c0_2 = arith.constant 0 : index
    %c0_3 = arith.constant 0 : index
    %2 = vector.load %arg5[%c0_2, %c0_3] : memref<32x32xf32, #tpu.memory_space<vmem>>, vector<32x32xf32>
    %cst = arith.constant dense<0.000000e+00> : vector<16x32xf32>
    %3 = tpu.matmul %1, %2, %cst {dimension_numbers = #tpu.dot_dimension_numbers<[1], [0], [0], [1], [0, 0, 1, 1], [], []>} : vector<16x32xf32>, vector<32x32xf32>, vector<16x32xf32> -> vector<16x32xf32>
    %c0_4 = arith.constant 0 : index
    %c0_5 = arith.constant 0 : index
    %c0_6 = arith.constant 0 : index
    %4 = vector.load %arg3[%c0_4, %c0_5, %c0_6] : memref<1x16x32xf32, #tpu.memory_space<vmem>>, vector<1x16x32xf32>
    %5 = vector.shape_cast %4 : vector<1x16x32xf32> to vector<16x32xf32>
    %c0_7 = arith.constant 0 : index
    %c0_8 = arith.constant 0 : index
    %6 = vector.load %arg6[%c0_7, %c0_8] : memref<32x32xf32, #tpu.memory_space<vmem>>, vector<32x32xf32>
    %cst_9 = arith.constant dense<0.000000e+00> : vector<16x32xf32>
    %7 = tpu.matmul %5, %6, %cst_9 {dimension_numbers = #tpu.dot_dimension_numbers<[1], [0], [0], [1], [0, 0, 1, 1], [], []>} : vector<16x32xf32>, vector<32x32xf32>, vector<16x32xf32> -> vector<16x32xf32>
    %c0_10 = arith.constant 0 : index
    %c0_11 = arith.constant 0 : index
    %c0_12 = arith.constant 0 : index
    %8 = vector.load %arg4[%c0_10, %c0_11, %c0_12] : memref<1x8x32xf32, #tpu.memory_space<vmem>>, vector<1x8x32xf32>
    %9 = vector.shape_cast %8 : vector<1x8x32xf32> to vector<8x32xf32>
    %c0_13 = arith.constant 0 : index
    %c0_14 = arith.constant 0 : index
    %10 = vector.load %arg7[%c0_13, %c0_14] : memref<32x32xf32, #tpu.memory_space<vmem>>, vector<32x32xf32>
    %cst_15 = arith.constant dense<0.000000e+00> : vector<8x32xf32>
    %11 = tpu.matmul %9, %10, %cst_15 {dimension_numbers = #tpu.dot_dimension_numbers<[1], [0], [0], [1], [0, 0, 1, 1], [], []>} : vector<8x32xf32>, vector<32x32xf32>, vector<8x32xf32> -> vector<8x32xf32>
    %cst_16 = arith.constant 0.176776692 : f32
    %12 = vector.broadcast %cst_16 : f32 to vector<8x32xf32>
    %13 = arith.mulf %11, %12 : vector<8x32xf32>
    %14 = vector.extract_strided_slice %13 {offsets = [0, 0], sizes = [8, 8], strides = [1, 1]} : vector<8x32xf32> to vector<8x8xf32>
    %15 = vector.extract_strided_slice %7 {offsets = [0, 0], sizes = [16, 8], strides = [1, 1]} : vector<16x32xf32> to vector<16x8xf32>
    %16 = vector.extract_strided_slice %3 {offsets = [0, 0], sizes = [16, 8], strides = [1, 1]} : vector<16x32xf32> to vector<16x8xf32>
    %cst_17 = arith.constant dense<0.000000e+00> : vector<8x16xf32>
    %17 = tpu.matmul %14, %15, %cst_17 {dimension_numbers = #tpu.dot_dimension_numbers<[1], [1], [0], [0], [0, 0, 1, 0], [], []>} : vector<8x8xf32>, vector<16x8xf32>, vector<8x16xf32> -> vector<8x16xf32>
    %c0_18 = arith.constant 0 : index
    %c0_19 = arith.constant 0 : index
    %c0_20 = arith.constant 0 : index
    %c0_21 = arith.constant 0 : index
    %18 = vector.load %arg1[%c0_18, %c0_19, %c0_20, %c0_21] : memref<1x4x8x16xf32, #tpu.memory_space<vmem>>, vector<1x1x8x16xf32>
    %19 = vector.shape_cast %18 : vector<1x1x8x16xf32> to vector<8x16xf32>
    %20 = arith.addf %17, %19 : vector<8x16xf32>
    %cst_22 = arith.constant dense<0xFF800000> : vector<8xf32>
    %21 = vector.multi_reduction <maximumf>, %20, %cst_22 [1] : vector<8x16xf32> to vector<8xf32>
    %22 = vector.shape_cast %21 : vector<8xf32> to vector<8x1xf32>
    %23 = vector.broadcast %22 : vector<8x1xf32> to vector<8x16xf32>
    %24 = arith.subf %20, %23 : vector<8x16xf32>
    %25 = math.exp %24 : vector<8x16xf32>
    %cst_23 = arith.constant dense<0.000000e+00> : vector<8xf32>
    %26 = vector.multi_reduction <add>, %25, %cst_23 [1] : vector<8x16xf32> to vector<8xf32>
    %27 = vector.shape_cast %26 : vector<8xf32> to vector<8x1xf32>
    %28 = tpu.reciprocal %27 {approx = true} : vector<8x1xf32> -> vector<8x1xf32>
    %29 = vector.broadcast %28 : vector<8x1xf32> to vector<8x16xf32>
    %30 = arith.mulf %25, %29 : vector<8x16xf32>
    %cst_24 = arith.constant dense<0.000000e+00> : vector<8x8xf32>
    %31 = tpu.matmul %30, %16, %cst_24 {dimension_numbers = #tpu.dot_dimension_numbers<[1], [0], [0], [1], [0, 0, 1, 1], [], []>} : vector<8x16xf32>, vector<16x8xf32>, vector<8x8xf32> -> vector<8x8xf32>
    %32 = vector.extract_strided_slice %13 {offsets = [0, 8], sizes = [8, 8], strides = [1, 1]} : vector<8x32xf32> to vector<8x8xf32>
    %33 = vector.extract_strided_slice %7 {offsets = [0, 8], sizes = [16, 8], strides = [1, 1]} : vector<16x32xf32> to vector<16x8xf32>
    %34 = vector.extract_strided_slice %3 {offsets = [0, 8], sizes = [16, 8], strides = [1, 1]} : vector<16x32xf32> to vector<16x8xf32>
    %cst_25 = arith.constant dense<0.000000e+00> : vector<8x16xf32>
    %35 = tpu.matmul %32, %33, %cst_25 {dimension_numbers = #tpu.dot_dimension_numbers<[1], [1], [0], [0], [0, 0, 1, 0], [], []>} : vector<8x8xf32>, vector<16x8xf32>, vector<8x16xf32> -> vector<8x16xf32>
    %c0_26 = arith.constant 0 : index
    %c1 = arith.constant 1 : index
    %c0_27 = arith.constant 0 : index
    %c0_28 = arith.constant 0 : index
    %36 = vector.load %arg1[%c0_26, %c1, %c0_27, %c0_28] : memref<1x4x8x16xf32, #tpu.memory_space<vmem>>, vector<1x1x8x16xf32>
    %37 = vector.shape_cast %36 : vector<1x1x8x16xf32> to vector<8x16xf32>
    %38 = arith.addf %35, %37 : vector<8x16xf32>
    %cst_29 = arith.constant dense<0xFF800000> : vector<8xf32>
    %39 = vector.multi_reduction <maximumf>, %38, %cst_29 [1] : vector<8x16xf32> to vector<8xf32>
    %40 = vector.shape_cast %39 : vector<8xf32> to vector<8x1xf32>
    %41 = vector.broadcast %40 : vector<8x1xf32> to vector<8x16xf32>
    %42 = arith.subf %38, %41 : vector<8x16xf32>
    %43 = math.exp %42 : vector<8x16xf32>
    %cst_30 = arith.constant dense<0.000000e+00> : vector<8xf32>
    %44 = vector.multi_reduction <add>, %43, %cst_30 [1] : vector<8x16xf32> to vector<8xf32>
    %45 = vector.shape_cast %44 : vector<8xf32> to vector<8x1xf32>
    %46 = tpu.reciprocal %45 {approx = true} : vector<8x1xf32> -> vector<8x1xf32>
    %47 = vector.broadcast %46 : vector<8x1xf32> to vector<8x16xf32>
    %48 = arith.mulf %43, %47 : vector<8x16xf32>
    %cst_31 = arith.constant dense<0.000000e+00> : vector<8x8xf32>
    %49 = tpu.matmul %48, %34, %cst_31 {dimension_numbers = #tpu.dot_dimension_numbers<[1], [0], [0], [1], [0, 0, 1, 1], [], []>} : vector<8x16xf32>, vector<16x8xf32>, vector<8x8xf32> -> vector<8x8xf32>
    %50 = vector.extract_strided_slice %13 {offsets = [0, 16], sizes = [8, 8], strides = [1, 1]} : vector<8x32xf32> to vector<8x8xf32>
    %51 = vector.extract_strided_slice %7 {offsets = [0, 16], sizes = [16, 8], strides = [1, 1]} : vector<16x32xf32> to vector<16x8xf32>
    %52 = vector.extract_strided_slice %3 {offsets = [0, 16], sizes = [16, 8], strides = [1, 1]} : vector<16x32xf32> to vector<16x8xf32>
    %cst_32 = arith.constant dense<0.000000e+00> : vector<8x16xf32>
    %53 = tpu.matmul %50, %51, %cst_32 {dimension_numbers = #tpu.dot_dimension_numbers<[1], [1], [0], [0], [0, 0, 1, 0], [], []>} : vector<8x8xf32>, vector<16x8xf32>, vector<8x16xf32> -> vector<8x16xf32>
    %c0_33 = arith.constant 0 : index
    %c2 = arith.constant 2 : index
    %c0_34 = arith.constant 0 : index
    %c0_35 = arith.constant 0 : index
    %54 = vector.load %arg1[%c0_33, %c2, %c0_34, %c0_35] : memref<1x4x8x16xf32, #tpu.memory_space<vmem>>, vector<1x1x8x16xf32>
    %55 = vector.shape_cast %54 : vector<1x1x8x16xf32> to vector<8x16xf32>
    %56 = arith.addf %53, %55 : vector<8x16xf32>
    %cst_36 = arith.constant dense<0xFF800000> : vector<8xf32>
    %57 = vector.multi_reduction <maximumf>, %56, %cst_36 [1] : vector<8x16xf32> to vector<8xf32>
    %58 = vector.shape_cast %57 : vector<8xf32> to vector<8x1xf32>
    %59 = vector.broadcast %58 : vector<8x1xf32> to vector<8x16xf32>
    %60 = arith.subf %56, %59 : vector<8x16xf32>
    %61 = math.exp %60 : vector<8x16xf32>
    %cst_37 = arith.constant dense<0.000000e+00> : vector<8xf32>
    %62 = vector.multi_reduction <add>, %61, %cst_37 [1] : vector<8x16xf32> to vector<8xf32>
    %63 = vector.shape_cast %62 : vector<8xf32> to vector<8x1xf32>
    %64 = tpu.reciprocal %63 {approx = true} : vector<8x1xf32> -> vector<8x1xf32>
    %65 = vector.broadcast %64 : vector<8x1xf32> to vector<8x16xf32>
    %66 = arith.mulf %61, %65 : vector<8x16xf32>
    %cst_38 = arith.constant dense<0.000000e+00> : vector<8x8xf32>
    %67 = tpu.matmul %66, %52, %cst_38 {dimension_numbers = #tpu.dot_dimension_numbers<[1], [0], [0], [1], [0, 0, 1, 1], [], []>} : vector<8x16xf32>, vector<16x8xf32>, vector<8x8xf32> -> vector<8x8xf32>
    %68 = vector.extract_strided_slice %13 {offsets = [0, 24], sizes = [8, 8], strides = [1, 1]} : vector<8x32xf32> to vector<8x8xf32>
    %69 = vector.extract_strided_slice %7 {offsets = [0, 24], sizes = [16, 8], strides = [1, 1]} : vector<16x32xf32> to vector<16x8xf32>
    %70 = vector.extract_strided_slice %3 {offsets = [0, 24], sizes = [16, 8], strides = [1, 1]} : vector<16x32xf32> to vector<16x8xf32>
    %cst_39 = arith.constant dense<0.000000e+00> : vector<8x16xf32>
    %71 = tpu.matmul %68, %69, %cst_39 {dimension_numbers = #tpu.dot_dimension_numbers<[1], [1], [0], [0], [0, 0, 1, 0], [], []>} : vector<8x8xf32>, vector<16x8xf32>, vector<8x16xf32> -> vector<8x16xf32>
    %c0_40 = arith.constant 0 : index
    %c3 = arith.constant 3 : index
    %c0_41 = arith.constant 0 : index
    %c0_42 = arith.constant 0 : index
    %72 = vector.load %arg1[%c0_40, %c3, %c0_41, %c0_42] : memref<1x4x8x16xf32, #tpu.memory_space<vmem>>, vector<1x1x8x16xf32>
    %73 = vector.shape_cast %72 : vector<1x1x8x16xf32> to vector<8x16xf32>
    %74 = arith.addf %71, %73 : vector<8x16xf32>
    %cst_43 = arith.constant dense<0xFF800000> : vector<8xf32>
    %75 = vector.multi_reduction <maximumf>, %74, %cst_43 [1] : vector<8x16xf32> to vector<8xf32>
    %76 = vector.shape_cast %75 : vector<8xf32> to vector<8x1xf32>
    %77 = vector.broadcast %76 : vector<8x1xf32> to vector<8x16xf32>
    %78 = arith.subf %74, %77 : vector<8x16xf32>
    %79 = math.exp %78 : vector<8x16xf32>
    %cst_44 = arith.constant dense<0.000000e+00> : vector<8xf32>
    %80 = vector.multi_reduction <add>, %79, %cst_44 [1] : vector<8x16xf32> to vector<8xf32>
    %81 = vector.shape_cast %80 : vector<8xf32> to vector<8x1xf32>
    %82 = tpu.reciprocal %81 {approx = true} : vector<8x1xf32> -> vector<8x1xf32>
    %83 = vector.broadcast %82 : vector<8x1xf32> to vector<8x16xf32>
    %84 = arith.mulf %79, %83 : vector<8x16xf32>
    %cst_45 = arith.constant dense<0.000000e+00> : vector<8x8xf32>
    %85 = tpu.matmul %84, %70, %cst_45 {dimension_numbers = #tpu.dot_dimension_numbers<[1], [0], [0], [1], [0, 0, 1, 1], [], []>} : vector<8x16xf32>, vector<16x8xf32>, vector<8x8xf32> -> vector<8x8xf32>
    %86 = tpu.concatenate %31, %49, %67, %85 in 1 : vector<8x8xf32>, vector<8x8xf32>, vector<8x8xf32>, vector<8x8xf32> -> vector<8x32xf32>
    %c0_46 = arith.constant 0 : index
    %c0_47 = arith.constant 0 : index
    %87 = vector.load %arg8[%c0_46, %c0_47] : memref<32x32xf32, #tpu.memory_space<vmem>>, vector<32x32xf32>
    %cst_48 = arith.constant dense<0.000000e+00> : vector<8x32xf32>
    %88 = tpu.matmul %86, %87, %cst_48 {dimension_numbers = #tpu.dot_dimension_numbers<[1], [0], [0], [1], [0, 0, 1, 1], [], []>} : vector<8x32xf32>, vector<32x32xf32>, vector<8x32xf32> -> vector<8x32xf32>
    %c0_49 = arith.constant 0 : index
    %c0_50 = arith.constant 0 : index
    %89 = vector.load %arg9[%c0_49, %c0_50] : memref<1x32xf32, #tpu.memory_space<vmem>>, vector<1x32xf32>
    %90 = vector.broadcast %89 : vector<1x32xf32> to vector<8x32xf32>
    %91 = arith.addf %88, %90 : vector<8x32xf32>
    %c0_51 = arith.constant 0 : index
    %c0_52 = arith.constant 0 : index
    %c0_53 = arith.constant 0 : index
    %92 = vector.load %arg10[%c0_51, %c0_52, %c0_53] : memref<1x8x32xf32, #tpu.memory_space<vmem>>, vector<1x8x32xf32>
    %93 = vector.shape_cast %92 : vector<1x8x32xf32> to vector<8x32xf32>
    %94 = vector.shape_cast %91 : vector<8x32xf32> to vector<1x8x32xf32>
    tpu.vector_store %arg10[%c0_51, %c0_52, %c0_53], %94 {strides = array<i32>} : memref<1x8x32xf32, #tpu.memory_space<vmem>>, vector<1x8x32xf32>,
    return
  }
  func.func @transform_0(%arg0: i32) -> (i32, i32, i32, i32) {
    %c0_i32 = arith.constant 0 : i32
    %c0_i32_0 = arith.constant 0 : i32
    %c0_i32_1 = arith.constant 0 : i32
    %c0_i32_2 = arith.constant 0 : i32
    return %arg0, %c0_i32, %c0_i32_0, %c0_i32_1 : i32, i32, i32, i32
  }
  func.func @transform_1(%arg0: i32) -> (i32, i32, i32) {
    %c0_i32 = arith.constant 0 : i32
    %c0_i32_0 = arith.constant 0 : i32
    %c0_i32_1 = arith.constant 0 : i32
    return %arg0, %c0_i32, %c0_i32_0 : i32, i32, i32
  }
  func.func @transform_2(%arg0: i32) -> (i32, i32, i32) {
    %c0_i32 = arith.constant 0 : i32
    %c0_i32_0 = arith.constant 0 : i32
    %c0_i32_1 = arith.constant 0 : i32
    return %arg0, %c0_i32, %c0_i32_0 : i32, i32, i32
  }
  func.func @transform_3(%arg0: i32) -> (i32, i32, i32) {
    %c0_i32 = arith.constant 0 : i32
    %c0_i32_0 = arith.constant 0 : i32
    %c0_i32_1 = arith.constant 0 : i32
    return %arg0, %c0_i32, %c0_i32_0 : i32, i32, i32
  }
  func.func @transform_4(%arg0: i32) -> (i32, i32) {
    %c0_i32 = arith.constant 0 : i32
    %c0_i32_0 = arith.constant 0 : i32
    %c0_i32_1 = arith.constant 0 : i32
    return %c0_i32, %c0_i32_0 : i32, i32
  }
  func.func @transform_5(%arg0: i32) -> (i32, i32) {
    %c0_i32 = arith.constant 0 : i32
    %c0_i32_0 = arith.constant 0 : i32
    %c0_i32_1 = arith.constant 0 : i32
    return %c0_i32, %c0_i32_0 : i32, i32
  }
  func.func @transform_6(%arg0: i32) -> (i32, i32) {
    %c0_i32 = arith.constant 0 : i32
    %c0_i32_0 = arith.constant 0 : i32
    %c0_i32_1 = arith.constant 0 : i32
    return %c0_i32, %c0_i32_0 : i32, i32
  }
  func.func @transform_7(%arg0: i32) -> (i32, i32) {
    %c0_i32 = arith.constant 0 : i32
    %c0_i32_0 = arith.constant 0 : i32
    %c0_i32_1 = arith.constant 0 : i32
    return %c0_i32, %c0_i32_0 : i32, i32
  }
  func.func @transform_8(%arg0: i32) -> (i32, i32) {
    %c0_i32 = arith.constant 0 : i32
    %c0_i32_0 = arith.constant 0 : i32
    %c0_i32_1 = arith.constant 0 : i32
    return %c0_i32, %c0_i32_0 : i32, i32
  }
  func.func @transform_9(%arg0: i32) -> (i32, i32, i32) {
    %c0_i32 = arith.constant 0 : i32
    %c0_i32_0 = arith.constant 0 : i32
    %c0_i32_1 = arith.constant 0 : i32
    return %arg0, %c0_i32, %c0_i32_0 : i32, i32, i32
  }
}

</mosaic_0001>

<bundles_post_ra>
// kernel: tpu_custom_call.1
= control target key start
LH: loop header
LB: loop body
LE: loop exit
PB: predicated region body
PF: predicated region fallthrough
CT: control target
= control target key end

     0   :  { %s2093_s0 = inlined_call_operand.hbm [shape: f32[2,4,8,16], index: 0, kind: input, shape index: {}]   ;;  %s2094_s1 = inlined_call_operand.hbm [shape: f32[2,16,32], index: 1, kind: input, shape index: {}]   ;;  %s2095_s2 = inlined_call_operand.hbm [shape: f32[2,16,32], index: 2, kind: input, shape index: {}]   ;;  %s2096_s3 = inlined_call_operand.hbm [shape: f32[2,8,32], index: 3, kind: input, shape index: {}]   ;;  %s2097_s4 = inlined_call_operand.hbm [shape: f32[32,32], index: 4, kind: input, shape index: {}]   ;;  %s2098_s5 = inlined_call_operand.hbm [shape: f32[32,32], index: 5, kind: input, shape index: {}]   ;;  %s2099_s6 = inlined_call_operand.hbm [shape: f32[32,32], index: 6, kind: input, shape index: {}]   ;;  %s2100_s7 = inlined_call_operand.hbm [shape: f32[32,32], index: 7, kind: input, shape index: {}]   ;;  %s2101_s8 = inlined_call_operand.vmem [shape: f32[1,32], index: 8, kind: input, shape index: {}]   ;;  %s2102_s9 = inlined_call_operand.hbm [shape: f32[2,8,32], index: 9, kind: output, shape index: {}]  }
   0x1   :  { %2116 = sst [smem:[#allocation30_spill]] %s2094_s1 }
   0x2   :  { %2117 = sst [smem:[#allocation31_spill]] %s2097_s4 }
   0x3   :  { %2118 = sst [smem:[#allocation32_spill]] %s2098_s5 }
   0x4   :  { %2119 = sst [smem:[#allocation33_spill]] %s2099_s6 }
   0x5   :  { %2120 = sst [smem:[#allocation34_spill]] %s2101_s8 }
   0x6   :  { %14 = vsyncpa [#allocation3], 0 }
   0x7   :  { %16 = vsyncpa [#allocation3 + $0x1], 0 }
   0x8   :  { %17 = vsyncpa [#allocation6], 0 }
   0x9   :  { %19 = vsyncpa [#allocation6 + $0x1], 0 }
   0xa   :  { %20 = vsyncpa [#allocation9], 0 }
   0xb   :  { %22 = vsyncpa [#allocation9 + $0x1], 0 }
   0xc   :  { %23 = vsyncpa [#allocation12], 0 }
   0xd   :  { %24 = vsyncpa [#allocation15], 0 }
   0xe   :  { %25 = vsyncpa [#allocation4], 0 }
   0xf   :  { %27 = vsyncpa [#allocation4 + $0x1], 0  ;;  %s1759_s30 = smov 0   ;;  %s1761_s10 = smov 0  }
  0x10   :  { %s1763_s11 = smov 0   ;;  %s1765_s12 = smov 0  }
  0x11 LB: > { %2121 = sst [smem:[#allocation24_spill]] %s1683_s30  ;;  %s1780_s13 = sadd.s32 4294967295, %s1695_s12   ;;  %s1695_s12 = sphi %s1765_s12, %s2151_s12   ;;  %s1691_s11 = sphi %s1763_s11, %s2153_s11   ;;  %s1687_s10 = sphi %s1761_s10, %s2155_s10   ;;  %s1683_s30 = sphi %s1759_s30, %s2154_s30  }
  0x12   : > { %2122 = sst [smem:[#allocation25_spill]] %s1691_s11  ;;  %s1167_s14 = sadd.s32 4294967294, %s1695_s12  }
  0x13   : > { %p53_p0 = scmp.ne.s32.totalorder %s1687_s10, %s1683_s30  ;;  %p2111_p1 = scmp.eq.s32.totalorder %s1780_s13, 0 }
  0x14   : > { %p260_p2 = scmp.eq.s32.totalorder %s1780_s13, 1  ;;  %p266_p3 = scmp.eq.s32.totalorder %s1167_s14, 1 }
  0x15   : > { %p1789_p4 = por %p2111_p1, %p53_p0  ;;  %p1168_p5 = scmp.ge.s32.totalorder %s1695_s12, 1 }
  0x16   : > { %p1794_p6 = por %p266_p3, %p53_p0  ;;  %p273_p7 = scmp.lt.s32.totalorder %s1695_s12, 3 }
  0x17   : > { %s2126_s4 = sld [smem:[#allocation31_spill]]  ;;  %s1697_s21 = smov [#allocation10]  }
  0x18   : > { %s2124_s16 = scalar_select %p1794_p6, 1, 0 }
  0x19   : > { %p1802_p8 = pnand %p1168_p5, %p273_p7  ;;  %s286_s22 = sshll.u32 %s1697_s21, 4  ;;  %s287_s22 = int_to_ptr.vmem [resolvable:$true] %s286_s22 }
  0x1a   : > { %2125 = sst [smem:[#allocation26_spill]] %s2124_s16  ;;  %s2103_s27 = smov 128  }
  0x1b   : > { %p1253_p9 = pneg %p1802_p8  ;;  %s2129_s5 = sld [smem:[#allocation32_spill]] }
  0x1c   : > { %s2105_s28 = smov 8   ;;  %s1700_s29 = smov [#allocation11]  }
  0x1d   : > { %s284_s19 = sshll.u32 %s2126_s4, 4  ;;  %p1810_p10 = pnand %p1253_p9, %p2111_p1  ;;  %s285_s19 = int_to_ptr.hbm [resolvable:$true] %s284_s19 }
  0x1e   : > { %s300_s14 = sshll.u32 %s1700_s29, 4  ;;  %s1829_s17 = sadd.s32 1, %s1695_s12   ;;  %s301_s14 = int_to_ptr.vmem [resolvable:$true] %s300_s14 }
  0x1f   : > { %1256 = dma.hbm_to_vmem [thread:$0]  (!%p1810_p10), %s285_s19, 512, %s287_s22, [#allocation9], %s2103_s27, %s2103_s27, %s2105_s28  }
  0x20   : > { %2130 = sst [smem:[#allocation27_spill]] %s1829_s17  ;;  %s40_s18 = sadd.s32 1, %s1691_s11 }
  0x21   : > { %s298_s26 = sshll.u32 %s2129_s5, 4  ;;  %s37_s21 = ssub.s32 %s1695_s12, %s1829_s17  ;;  %s299_s26 = int_to_ptr.hbm [resolvable:$true] %s298_s26 }
  0x22   : > { %1259 = dma.hbm_to_vmem [thread:$0]  (!%p1810_p10), %s299_s26, 512, %s301_s14, [#allocation12], %s2103_s27, %s2103_s27, %s2105_s28  }
  0x23   : > { %p47_p12 = scmp.ne.s32.totalorder %s1691_s11, %s1687_s10  ;;  %p38_p13 = scmp.eq.s32.totalorder %s37_s21, 0 }
  0x24   : > { %p48_p0 = scmp.eq.s32.totalorder %s1695_s12, 0  ;;  %p1287_p5 = scmp.lt.s32.totalorder %s1695_s12, 2 }
  0x25   : > { %p1839_p3 = por %p260_p2, %p47_p12  ;;  %s1848_s24 = sand.u32 1, %s1691_s11  }
  0x26   : > { %s1845_s22 = scalar_select %p38_p13, %s1691_s11, %s40_s18  }
  0x27   : > { %s2131_s19 = scalar_select %p1839_p3, 1, 0 }
  0x28   : > { %2133 = sst [smem:[#allocation29_spill]] %s1845_s22  ;;  %p49_p7 = por %p48_p0, %p47_p12 }
  0x29   : > { %2132 = sst [smem:[#allocation28_spill]] %s2131_s19  ;;  %s2112_s25 = sand.u32 1, %s1695_s12  }
  0x2a   : > { %s1177_s26 = sshll.u32 %s1848_s24, 4  ;;  %p1852_p9 = pnand %p1287_p5, %p49_p7 }
  0x2b   : > { %s1225_s14 = sshll.u32 %s1695_s12, 4  ;;  %s2135_s1 = sld [smem:[#allocation30_spill]] }
  0x2c   : > { %s371_s18 = scalar_lea.vmem [#allocation5], %s1177_s26  ;;  %s1862_s22 = scalar_lea.sflag [#allocation6], %s2112_s25 }
  0x2d   : > { %s379_s5 = sshll.u32 %s371_s18, 4  ;;  %p1433_p12 = pneg %p1852_p9  ;;  %s380_s5 = int_to_ptr.vmem [resolvable:$true] %s379_s5 }
  0x31   : > { %s376_s28 = scalar_lea.hbm %s2135_s1, %s1225_s14 }
  0x32   : > { %s377_s4 = sshll.u32 %s376_s28, 4  ;;  %s1436_s28 = scalar_lea.hbm %s2135_s1, 32  ;;  %s378_s4 = int_to_ptr.hbm [resolvable:$true] %s377_s4 }
  0x33   : > { %s1429_s11 = sshra.s32 %s378_s4, 4  ;;  %s1430_s11 = int_to_ptr.hbm [resolvable:$true] %s1429_s11 }
  0x34   : > { %s1431_s17 = scalar_lea.hbm %s1430_s11, 16  ;;  %p1437_p5 = scmp.lt.s32.totalorder %s1430_s11, %s2135_s1 }
  0x35   : > { %p1432_p2 = scmp.ne.s32.totalorder %s1430_s11, %s1431_s17  ;;  %p1438_p7 = scmp.lt.s32.totalorder %s1436_s28, %s1431_s17 }
  0x37   : > { %p1434_p13 = pnand %p1433_p12, %p1432_p2  ;;  %p1439_p11 = por %p1438_p7, %p1437_p5 }
  0x39   : > { %p1435_p0 = pneg %p1434_p13 }
  0x3b   : > { %p1440_p1 = pnand %p1439_p11, %p1435_p0 }
  0x3d   : > { %1443 = shalt.err (!%p1440_p1)
}
  0x3e   : > { %s2136_s25 = smov 8   ;;  %s2137_s30 = smov 128  }
  0x3f   : > { %1272 = dma.hbm_to_vmem [thread:$0]  (!%p1852_p9), %s378_s4, 256, %s380_s5, %s1862_s22, %s2137_s30, %s2137_s30, %s2136_s25  }
  0x40   : > { %s398_s27 = scalar_lea.hbm %s2095_s2, %s1225_s14  ;;  %s393_s16 = scalar_lea.vmem [#allocation7], %s1177_s26 }
  0x41   : > { %s399_s21 = sshll.u32 %s398_s27, 4  ;;  %s401_s11 = sshll.u32 %s393_s16, 4  ;;  %s1884_s21 = int_to_ptr.hbm [resolvable:$true] %s399_s21  ;;  %s1886_s11 = int_to_ptr.vmem [resolvable:$true] %s401_s11 }
  0x42   : > { %s2138_s6 = sld [smem:[#allocation33_spill]]  ;;  %s1701_s4 = smov [#allocation13]  }
  0x43   : > { %s314_s5 = sshll.u32 %s1701_s4, 4  ;;  %s326_s26 = sshll.u32 %s2100_s7, 4  ;;  %s315_s5 = int_to_ptr.vmem [resolvable:$true] %s314_s5  ;;  %s327_s26 = int_to_ptr.hbm [resolvable:$true] %s326_s26 }
  0x44   : > { %s1702_s14 = smov [#allocation14]   ;;  %s1174_s16 = sshll.u32 %s1848_s24, 5 }
  0x45   : > { %s328_s27 = sshll.u32 %s1702_s14, 4  ;;  %s1224_s17 = sshll.u32 %s1695_s12, 5  ;;  %s329_s27 = int_to_ptr.vmem [resolvable:$true] %s328_s27 }
  0x46   : > { %1265 = dma.hbm_to_vmem [thread:$0]  (!%p1810_p10), %s327_s26, 512, %s329_s27, [#allocation15], %s2137_s30, %s2137_s30, %s2136_s25  }
  0x47   : > { %s354_s8 = scalar_lea.hbm %s2093_s0, %s1224_s17  ;;  %s349_s19 = scalar_lea.vmem [#allocation2], %s1174_s16 }
  0x48   : > { %s312_s18 = sshll.u32 %s2138_s6, 4  ;;  %s357_s1 = sshll.u32 %s349_s19, 4  ;;  %s313_s18 = int_to_ptr.hbm [resolvable:$true] %s312_s18  ;;  %s358_s1 = int_to_ptr.vmem [resolvable:$true] %s357_s1 }
  0x49   : > { %1262 = dma.hbm_to_vmem [thread:$0]  (!%p1810_p10), %s313_s18, 512, %s315_s5, [#allocation12], %s2137_s30, %s2137_s30, %s2136_s25  }
  0x4a   : > { %s355_s6 = sshll.u32 %s354_s8, 4  ;;  %s346_s18 = scalar_lea.sflag [#allocation3], %s1848_s24  ;;  %s356_s6 = int_to_ptr.hbm [resolvable:$true] %s355_s6 }
  0x4b   : > { %s1519_s5 = sshra.s32 %s356_s6, 4  ;;  %s1526_s27 = scalar_lea.hbm %s2093_s0, 64  ;;  %s1520_s5 = int_to_ptr.hbm [resolvable:$true] %s1519_s5 }
  0x4c   : > { %s1521_s14 = scalar_lea.hbm %s1520_s5, 32  ;;  %p1527_p10 = scmp.lt.s32.totalorder %s1520_s5, %s2093_s0 }
  0x4d   : > { %p1522_p1 = scmp.ne.s32.totalorder %s1520_s5, %s1521_s14  ;;  %p1528_p13 = scmp.lt.s32.totalorder %s1526_s27, %s1521_s14 }
  0x4f   : > { %p1524_p11 = pnand %p1522_p1, %p1433_p12  ;;  %p1529_p0 = por %p1528_p13, %p1527_p10 }
  0x51   : > { %p1525_p2 = pneg %p1524_p11 }
  0x53   : > { %p1530_p5 = pnand %p1529_p0, %p1525_p2 }
  0x55   : > { %1533 = shalt.err (!%p1530_p5)
}
  0x56   : > { %1269 = dma.hbm_to_vmem [thread:$0]  (!%p1852_p9), %s356_s6, 512, %s358_s1, %s346_s18, %s2137_s30, %s2137_s30, %s2136_s25  }
  0x57   : > { %s1549_s16 = sshra.s32 %s1884_s21, 4  ;;  %s1556_s5 = scalar_lea.hbm %s2095_s2, 32  ;;  %s1550_s16 = int_to_ptr.hbm [resolvable:$true] %s1549_s16 }
  0x58   : > { %s1551_s4 = scalar_lea.hbm %s1550_s16, 16  ;;  %p1557_p2 = scmp.lt.s32.totalorder %s1550_s16, %s2095_s2 }
  0x59   : > { %p1552_p7 = scmp.ne.s32.totalorder %s1550_s16, %s1551_s4  ;;  %p1558_p10 = scmp.lt.s32.totalorder %s1556_s5, %s1551_s4 }
  0x5b   : > { %p1554_p1 = pnand %p1552_p7, %p1433_p12  ;;  %p1559_p13 = por %p1558_p10, %p1557_p2 }
  0x5d   : > { %p1555_p11 = pneg %p1554_p1 }
  0x5f   : > { %p1560_p0 = pnand %p1559_p13, %p1555_p11 }
  0x61   : > { %1563 = shalt.err (!%p1560_p0)
}
  0x62   : > { %1275 = dma.hbm_to_vmem [thread:$0]  (!%p1852_p9), %s1884_s21, 256, %s1886_s11, %s1862_s22, %s2137_s30, %s2137_s30, %s2136_s25  }
  0x63   : > { %s1183_s1 = sshll.u32 %s1848_s24, 3  ;;  %s1184_s6 = sshll.u32 %s1695_s12, 3 }
  0x64   : > { %s419_s27 = scalar_lea.hbm %s2096_s3, %s1184_s6  ;;  %s415_s17 = scalar_lea.vmem [#allocation8], %s1183_s1 }
  0x65   : > { %s421_s28 = sshll.u32 %s419_s27, 4  ;;  %s423_s16 = sshll.u32 %s415_s17, 4  ;;  %s422_s28 = int_to_ptr.hbm [resolvable:$true] %s421_s28  ;;  %s424_s16 = int_to_ptr.vmem [resolvable:$true] %s423_s16 }
  0x66   : > { %s2139_s4 = sand.u32 1, %s1695_s12   ;;  %s1579_s19 = sshra.s32 %s422_s28, 4  ;;  %s1580_s19 = int_to_ptr.hbm [resolvable:$true] %s1579_s19 }
  0x67   : > { %s412_s8 = scalar_lea.sflag [#allocation9], %s2139_s4  ;;  %s1581_s5 = scalar_lea.hbm %s1580_s19, 8 }
  0x68   : > { %p1582_p5 = scmp.ne.s32.totalorder %s1580_s19, %s1581_s5  ;;  %s1586_s24 = scalar_lea.hbm %s2096_s3, 16 }
  0x69   : > { %p1587_p11 = scmp.lt.s32.totalorder %s1580_s19, %s2096_s3  ;;  %p1588_p2 = scmp.lt.s32.totalorder %s1586_s24, %s1581_s5 }
  0x6a   : > { %p1584_p7 = pnand %p1582_p5, %p1433_p12 }
  0x6b   : > { %p1589_p10 = por %p1588_p2, %p1587_p11 }
  0x6c   : > { %p1585_p1 = pneg %p1584_p7 }
  0x6e   : > { %p1590_p13 = pnand %p1589_p10, %p1585_p1 }
  0x70   : > { %1593 = shalt.err (!%p1590_p13)
}
  0x71   : > { %1278 = dma.hbm_to_vmem [thread:$0]  (!%p1852_p9), %s422_s28, 128, %s424_s16, %s412_s8  }
  0x72   : > { %432 = sbr.rel (%p1802_p8) target bundleno = 1193 (0x4a9), region = 56  ;;  %s1963_s11 = sand.u32 (!%p1802_p8), 1, %s1687_s10  }
  0x73   : > { %s1186_s14 = sshll.u32 (!%p1802_p8), %s1963_s11, 5  ;;  %s435_s23 = scalar_lea.sflag (!%p1802_p8), [#allocation3], %s1963_s11 }
  0x74   : > { %s1967_s1 = scalar_lea.vmem (!%p1802_p8), [#allocation2], %s1186_s14 }
  0x77   : > { %1654 = dma.done.wait (%p1789_p4), %s435_s23, 512  }
  0x78   : > { %1656 = vsyncadd (%p1789_p4), %s435_s23, 4294966784  ;;  %s444_s20 = sand.u32 1, %s1780_s13   ;;  %s1187_s29 = sshll.u32 %s1963_s11, 4 }
  0x79   : > { %s445_s6 = scalar_lea.sflag [#allocation6], %s444_s20  ;;  %s1975_s18 = scalar_lea.vmem [#allocation5], %s1187_s29 }
  0x7a   : > { %1658 = dma.done.wait (%p1789_p4), %s445_s6, 512  }
  0x7b   : > { %1660 = vsyncadd (%p1789_p4), %s445_s6, 4294966784  ;;  %s1189_s26 = sshll.u32 %s1963_s11, 3  ;;  %s1982_s27 = scalar_lea.vmem [#allocation7], %s1187_s29 }
  0x7c   : > { %s465_s28 = scalar_lea.sflag [#allocation9], %s444_s20  ;;  %s468_s17 = scalar_lea.vmem [#allocation8], %s1189_s26 }
  0x7d   : > { %1662 = dma.done.wait (%p1789_p4), %s465_s28, 128  }
  0x7e   : > { %1664 = vsyncadd (%p1789_p4), %s465_s28, 4294967168  ;;  %p2140_p8 = scmp.eq.s32.totalorder %s1780_s13, 0 }
  0x80   : > { %1666 = dma.done.wait (%p2140_p8), [#allocation9], 512   ;;  %p2141_p9 = pmov %p2140_p8 }
  0x81   : > { %p2142_p12 = pmov %p2140_p8 }
  0x82   : > { %1668 = vsyncadd (%p2141_p9), [#allocation9], 4294966784 }
  0x83   : > { %1670 = dma.done.wait (%p2142_p12), [#allocation12], 1024   ;;  %p2143_p0 = pmov %p2140_p8 }
  0x85   : > { %1672 = vsyncadd (%p2143_p0), [#allocation12], 4294966272  ;;  %p2144_p5 = pmov %p2143_p0 }
  0x86   : > { %p2145_p7 = pmov %p2143_p0 }
  0x87   : > { %1674 = dma.done.wait (%p2144_p5), [#allocation15], 512  }
  0x88   : > { %1676 = vsyncadd (%p2145_p7), [#allocation15], 4294966784  ;;  %v580_v0 = vld [vmem:[#allocation11 + $0x18] sm:$0xff]  ;;  %v579_v2 = vld [vmem:[#allocation11 + $0x10] sm:$0xff]  ;;  %vm545_vm0 = vcmask 261120   ;;  %s1703_s15 = smov 112  }
  0x89   : > { %v614_v1 = vld [vmem:[#allocation13 + $0x18] sm:$0xff]  ;;  %599 = vmatpush.msra.mxu1 %v580_v0  ;;  %v613_v3 = vld [vmem:[#allocation13 + $0x10] sm:$0xff]  ;;  %v578_v4 = vld [vmem:[#allocation11 + $0x8] sm:$0xff]  ;;  %vm640_vm1 = vcmask 64512   ;;  %s1704_s16 = smov 120   ;;  %s1705_s4 = smov 104  }
  0x8a   : > { %630 = vmatpush.msra.mxu2 %v614_v1  ;;  %v612_v5 = vld [vmem:[#allocation13 + $0x8] sm:$0xff]  ;;  %v577_v6 = vld [vmem:[#allocation11] sm:$0xff]  ;;  %v610_v9 = vld [vmem:[%s468_s17] sm:$0xff]  ;;  %vm670_vm2 = vcmask 130048   ;;  %s1706_s8 = smov 8   ;;  %s1707_s19 = smov 24  }
  0x8b   : > { %600 = vmatpush.msra.mxu1 %v579_v2  ;;  %v611_v7 = vld [vmem:[#allocation13] sm:$0xff]  ;;  %v576_v10 = vld [vmem:[%s1982_s27 + $0x8] sm:$0xff]  ;;  %v543_v16 = vld [vmem:[#allocation10 + $0x10] sm:$0xff]  ;;  %s1708_s5 = smov 16   ;;  %vm943_vm3 = vcmask 195584   ;;  %s1221_s30 = sshll.u32 %s1780_s13, 3 }
  0x8c   : > { %631 = vmatpush.msra.mxu2 %v613_v3  ;;  %v575_v8 = vld [vmem:[%s1982_s27] sm:$0xff]  ;;  %v544_v15 = vld [vmem:[#allocation10 + $0x18] sm:$0xff]  ;;  %v542_v17 = vld [vmem:[#allocation10 + $0x8] sm:$0xff]  ;;  %s988_s21 = scalar_lea.hbm %s2102_s9, %s1221_s30  ;;  %s538_s20 = scalar_lea.vmem [#allocation16], %s1189_s26 }
  0x8d   : > { %601 = vmatpush.msra.mxu1 %v578_v4  ;;  %564 = vmatpush.msra.mxu0 %v544_v15  ;;  %v639_v27 = vld [vmem:[%s1967_s1] sm:$0xff]  ;;  %v541_v31 = vld [vmem:[#allocation10] sm:$0xff]  ;;  %v540_v33 = vld [vmem:[%s1975_s18 + $0x8] sm:$0xff]  ;;  %s990_s29 = sshll.u32 %s538_s20, 4  ;;  %s992_s6 = sshll.u32 %s988_s21, 4  ;;  %s991_s29 = int_to_ptr.vmem [resolvable:$true] %s990_s29  ;;  %s993_s6 = int_to_ptr.hbm [resolvable:$true] %s992_s6 }
  0x8e   : > { %632 = vmatpush.msra.mxu2 %v612_v5  ;;  %v539_v32 = vld [vmem:[%s1975_s18] sm:$0xff]  ;;  %v1204_v36 = vld [vmem:[%s1967_s1 + $0x8] sm:$0xff]  ;;  %v1214_v45 = vld [vmem:[%s1967_s1 + $0x18] sm:$0xff]  ;;  %s978_s13 = scalar_lea.sflag [#allocation4], %s1963_s11  ;;  %s1623_s18 = sshra.s32 %s993_s6, 4  ;;  %s1624_s18 = int_to_ptr.hbm [resolvable:$true] %s1623_s18 }
  0x8f   : > { %602 = vmatpush.msra.mxu1 %v577_v6  ;;  %565 = vmatpush.msra.mxu0 %v543_v16  ;;  %v1209_v34 = vld [vmem:[%s1967_s1 + $0x10] sm:$0xff]  ;;  %s2147_s1 = sld [smem:[#allocation34_spill]]  ;;  %s1625_s27 = scalar_lea.hbm %s1624_s18, 8 }
  0x90   : > { %633 = vmatpush.msra.mxu2 %v611_v7  ;;  %1197 = vmatmul.msk.f32.vlgmr.msra.gmra.mxu1 %vm545_vm0, %v575_v8  ;;  %p1626_p4 = scmp.ne.s32.totalorder %s1624_s18, %s1625_s27  ;;  %s1629_s26 = scalar_lea.hbm %s2102_s9, 16 }
  0x91   : > { %1199 = vmatmul.msk.f32.vlgmr.msra.gmra.mxu2 %vm545_vm0, %v610_v9  ;;  %566 = vmatpush.msra.mxu0 %v542_v17  ;;  %p1630_p2 = scmp.lt.s32.totalorder %s1624_s18, %s2102_s9  ;;  %p1631_p10 = scmp.lt.s32.totalorder %s1629_s26, %s1625_s27 }
  0x92   : > { %p1627_p1 = pnand %p1626_p4, %p1839_p3 }
  0x93   : > { %567 = vmatpush.msra.mxu0 %v541_v31  ;;  %v947_v31 = vld [vmem:[#allocation14 + $0x10] sm:$0xff]  ;;  %p1632_p13 = por %p1631_p10, %p1630_p2 }
  0x94   : > { %1195 = vmatmul.msk.f32.vlgmr.msra.gmra.mxu0 %vm545_vm0, %v539_v32  ;;  %v946_v32 = vld [vmem:[#allocation14 + $0x8] sm:$0xff]  ;;  %p1628_p11 = pneg %p1627_p1 }
  0x96   : > { %p1633_p8 = pnand %p1632_p13, %p1628_p11 }
  0x98   : > { %1198 = vmatmul.msk.f32.gmra.mxu1 %vm545_vm0, %v576_v10 }
  0x9c   : > { %1196 = vmatmul.msk.f32.gmra.mxu0 %vm545_vm0, %v540_v33  ;;  %v945_v33 = vld [vmem:[#allocation14] sm:$0xff] }
 0x10d   : > { %v604_v11 = vpop.f32.mrf.mxu1 }
 0x10e   : > { %785 = vrot.lane.b32.xlu2 %v604_v11, %s1703_s15 }
 0x111   : > { %v569_v51 = vpop.f32.mrf.mxu0 }
 0x114   : > { %v635_v12 = vpop.f32.mrf.mxu2 }
 0x115   : > { %v638_v13 = vmul.f32 0.17677669, %v635_v12  ;;  %v607_v14 = vpop.f32.mrf.mxu1 }
 0x116   : > { %861 = vrot.lane.b32.xlu2 %v607_v14, %s1705_s4  ;;  %711 = vrot.lane.b32.xlu0 %v607_v14, %s1704_s16 }
 0x117   : > { %707 = vrot.lane.b32.xlu1 %v638_v13, %s1704_s16  ;;  %1200 = vmatpush.xpose.msk.msra.mxu3 %vm640_vm1, %v607_v14 }
 0x119   : > { %v572_v52 = vpop.f32.mrf.mxu0 }
 0x11a   : > { %699 = vmatpush.msrb.mxu2 %v572_v52  ;;  %v1337_v53 = vpack.i.bf16 %v569_v51, %v572_v52 }
 0x11b   : > { %1201 = vmatpush.xpose.msk.msra.mxu3 %vm640_vm1, %v604_v11 }
 0x11c   : > { %700 = vmatpush.msrb.mxu2 %v569_v51 }
 0x11e   : > { %1202 = vmatmul.msk.f32.vlgmr.msra.gmra.mxu3 %vm640_vm1, %v638_v13  ;;  %709 = vrot.lane.b32.xlu0 %v604_v11, %s1704_s16 }
 0x11f   : > { %787 = vrot.lane.b32.xlu1 %v607_v14, %s1703_s15  ;;  %857 = vrot.lane.b32.xlu2 %v638_v13, %s1705_s4 }
 0x126   : > { %859 = vrot.lane.b32.xlu0 %v604_v11, %s1705_s4 }
 0x127   : > { %783 = vrot.lane.b32.xlu1 %v638_v13, %s1703_s15 }
 0x168   : > { %v786_v18 = vpop.permute.xlu2 %785 }
 0x170   : > { %v862_v23 = vpop.permute.xlu2 %861 }
 0x179   : > { %v858_v26 = vpop.permute.xlu2 %857 }
 0x188   : > { %v712_v20 = vpop.permute.xlu0 %711 }
 0x189   : > { %v708_v19 = vpop.permute.xlu1 %707  ;;  %1205 = vmatpush.xpose.msk.msrb.mxu3 %vm640_vm1, %v712_v20 }
 0x190   : > { %v710_v22 = vpop.permute.xlu0 %709 }
 0x191   : > { %v788_v21 = vpop.permute.xlu1 %787  ;;  %1206 = vmatpush.xpose.msk.msrb.mxu3 %vm640_vm1, %v710_v22 }
 0x192   : > { %1210 = vmatpush.xpose.msk.msrb.mxu1 %vm640_vm1, %v788_v21 }
 0x194   : > { %1207 = vmatmul.msk.f32.vlgmr.msrb.gmra.mxu3 %vm640_vm1, %v708_v19 }
 0x195   : > { %1215 = vmatpush.xpose.msk.msra.mxu3 %vm640_vm1, %v862_v23 }
 0x196   : > { %1211 = vmatpush.xpose.msk.msrb.mxu1 %vm640_vm1, %v786_v18 }
 0x198   : > { %v860_v25 = vpop.permute.xlu0 %859 }
 0x199   : > { %v784_v24 = vpop.permute.xlu1 %783  ;;  %1216 = vmatpush.xpose.msk.msra.mxu3 %vm640_vm1, %v860_v25 }
 0x19a   : > { %1212 = vmatmul.msk.f32.vlgmr.msrb.gmra.mxu1 %vm640_vm1, %v784_v24 }
 0x19c   : > { %1217 = vmatmul.msk.f32.vlgmr.msra.gmra.mxu3 %vm640_vm1, %v858_v26 }
 0x1a1   : > { %v667_v28 = vpop.f32.mrf.mxu3 }
 0x1a2   : > { %v668_v29 = vadd.f32 %v667_v28, %v639_v27 }
 0x1a4   : > { %v671_v30 = vsel %vm670_vm2, %v668_v29, -inf }
 0x1a5   : > { %672 = vmax.xlane.f32.xlu0 %v671_v30  ;;  %v948_v30 = vld [vmem:[#allocation14 + $0x18] sm:$0xff] }
 0x1a6   : > { %968 = vmatpush.msra.mxu1 %v948_v30 }
 0x1a8   : > { %969 = vmatpush.msra.mxu1 %v947_v31 }
 0x1aa   : > { %970 = vmatpush.msra.mxu1 %v946_v32 }
 0x1ac   : > { %971 = vmatpush.msra.mxu1 %v945_v33 }
 0x217   : > { %v812_v35 = vpop.f32.mrf.mxu1  ;;  %v736_v38 = vpop.f32.mrf.mxu3 }
 0x218   : > { %v813_v37 = vadd.f32 %v1209_v34, %v812_v35  ;;  %v673_v39 = vpop.xlane.xlu0 %672  ;;  %v737_v40 = vadd.f32 %v1204_v36, %v736_v38 }
 0x219   : > { %v674_v41 = vsub.f32 %v668_v29, %v673_v39 }
 0x21a   : > { %v815_v42 = vsel %vm670_vm2, %v813_v37, -inf  ;;  %v739_v44 = vsel %vm670_vm2, %v737_v40, -inf }
 0x21b   : > { %816 = vmax.xlane.f32.xlu2 %v815_v42  ;;  %v675_v43 = vmul.f32 1.442695, %v674_v41  ;;  %740 = vmax.xlane.f32.xlu1 %v739_v44 }
 0x21d   : > { %1353 = vpow2.f32 %v675_v43 }
 0x21f   : > { %v886_v46 = vpop.f32.mrf.mxu3 }
 0x220   : > { %v887_v47 = vadd.f32 %v1214_v45, %v886_v46 }
 0x222   : > { %v889_v49 = vsel %vm670_vm2, %v887_v47, -inf }
 0x223   : > { %v1354_v48 = vpop.eup %1353  ;;  %890 = vmax.xlane.f32.xlu2 %v889_v49 }
 0x224   : > { %v677_v50 = vsel %vm670_vm2, %v1354_v48, 0.0 }
 0x225   : > { %678 = vadd.xlane.f32.xlu0 %v677_v50 }
 0x239   : > { %1338 = vrot.lane.b32.xlu0 %v1337_v53, %s1704_s16 }
 0x28e   : > { %v817_v54 = vpop.xlane.xlu2 %816  ;;  %v741_v56 = vpop.xlane.xlu1 %740 }
 0x28f   : > { %v818_v55 = vsub.f32 %v813_v37, %v817_v54  ;;  %v742_v58 = vsub.f32 %v737_v40, %v741_v56  ;;  %v1352_v40 = vld [vmem:[%s2147_s1] ss:$0 sm:$0xff] }
 0x291   : > { %v819_v57 = vmul.f32 1.442695, %v818_v55  ;;  %v743_v59 = vmul.f32 1.442695, %v742_v58 }
 0x293   : > { %1355 = vpow2.f32 %v819_v57 }
 0x294   : > { %1357 = vpow2.f32 %v743_v59 }
 0x296   : > { %v891_v60 = vpop.xlane.xlu2 %890 }
 0x297   : > { %v892_v62 = vsub.f32 %v887_v47, %v891_v60 }
 0x298   : > { %v679_v63 = vpop.xlane.xlu0 %678 }
 0x299   : > { %v1356_v61 = vpop.eup %1355  ;;  %1359 = vrcp.f32 %v679_v63  ;;  %v893_v2 = vmul.f32 1.442695, %v892_v62 }
 0x29a   : > { %v821_v0 = vsel %vm670_vm2, %v1356_v61, 0.0  ;;  %v1358_v1 = vpop.eup %1357 }
 0x29b   : > { %822 = vadd.xlane.f32.xlu2 %v821_v0  ;;  %v745_v3 = vsel %vm670_vm2, %v1358_v1, 0.0  ;;  %1361 = vpow2.f32 %v893_v2 }
 0x29c   : > { %746 = vadd.xlane.f32.xlu1 %v745_v3 }
 0x29f   : > { %v1360_v4 = vpop.eup %1359 }
 0x2a0   : > { %v681_v5 = vmul.f32 %v1360_v4, %v1354_v48 }
 0x2a1   : > { %v1362_v6 = vpop.eup %1361 }
 0x2a2   : > { %1203 = vmatmul.msk.f32.vlgmr.msrb.gmra.mxu2 %vm670_vm2, %v681_v5  ;;  %v895_v7 = vsel %vm670_vm2, %v1362_v6, 0.0 }
 0x2a3   : > { %896 = vadd.xlane.f32.xlu2 %v895_v7 }
 0x2ab   : > { %v1339_v8 = vpop.permute.xlu0 %1338 }
 0x2ac   : > { %v1340_v9 = vunpack.i.l.bf16 %v1339_v8  ;;  %v1341_v10 = vunpack.i.h.bf16 %v1339_v8 }
 0x2ae   : > { %775 = vmatpush.msrb.mxu0 %v1340_v9 }
 0x2b0   : > { %776 = vmatpush.msrb.mxu0 %v1341_v10 }
 0x2b5   : > { %1343 = vrot.lane.b32.xlu1 %v1337_v53, %s1703_s15 }
 0x2bb   : > { %1348 = vrot.lane.b32.xlu2 %v1337_v53, %s1705_s4 }
 0x30e   : > { %v823_v11 = vpop.xlane.xlu2 %822 }
 0x30f   : > { %v747_v12 = vpop.xlane.xlu1 %746 }
 0x310   : > { %1363 = vrcp.f32 %v747_v12 }
 0x316   : > { %v1364_v13 = vpop.eup %1363  ;;  %v897_v14 = vpop.xlane.xlu2 %896 }
 0x317   : > { %v749_v15 = vmul.f32 %v1364_v13, %v1358_v1  ;;  %1365 = vrcp.f32 %v897_v14 }
 0x318   : > { %1367 = vrcp.f32 %v823_v11 }
 0x319   : > { %1208 = vmatmul.msk.f32.vlgmr.msrb.gmra.mxu0 %vm670_vm2, %v749_v15 }
 0x31d   : > { %v1366_v17 = vpop.eup %1365 }
 0x31e   : > { %v1349_v16 = vpop.permute.xlu2 %1348  ;;  %v899_v20 = vmul.f32 %v1366_v17, %v1362_v6  ;;  %v1368_v22 = vpop.eup %1367 }
 0x31f   : > { %v1350_v18 = vunpack.i.l.bf16 %v1349_v16  ;;  %v1351_v19 = vunpack.i.h.bf16 %v1349_v16  ;;  %v825_v25 = vmul.f32 %v1368_v22, %v1356_v61 }
 0x321   : > { %923 = vmatpush.msra.mxu0 %v1350_v18 }
 0x323   : > { %924 = vmatpush.msra.mxu0 %v1351_v19 }
 0x324   : > { %1218 = vmatmul.msk.f32.vlgmr.msra.gmra.mxu0 %vm670_vm2, %v899_v20 }
 0x325   : > { %v702_v28 = vpop.f32.mrf.mxu2 }
 0x327   : > { %v1344_v21 = vpop.permute.xlu1 %1343 }
 0x328   : > { %v1345_v23 = vunpack.i.l.bf16 %v1344_v21  ;;  %v1346_v24 = vunpack.i.h.bf16 %v1344_v21 }
 0x32a   : > { %849 = vmatpush.msra.mxu2 %v1345_v23 }
 0x32c   : > { %850 = vmatpush.msra.mxu2 %v1346_v24 }
 0x32d   : > { %1213 = vmatmul.msk.f32.vlgmr.msra.gmra.mxu2 %vm670_vm2, %v825_v25 }
 0x396   : > { %v778_v26 = vpop.f32.mrf.mxu0 }
 0x397   : > { %930 = vrot.lane.b32.xlu0 %v778_v26, %s1706_s8 }
 0x3a1   : > { %v926_v27 = vpop.f32.mrf.mxu0 }
 0x3a2   : > { %938 = vrot.lane.b32.xlu0 %v926_v27, %s1707_s19 }
 0x3b0   : > { %v852_v29 = vpop.f32.mrf.mxu2 }
 0x3b1   : > { %934 = vrot.lane.b32.xlu1 %v852_v29, %s1708_s5 }
 0x409   : > { %v931_v34 = vpop.permute.xlu0 %930 }
 0x40a   : > { %v941_v35 = vsel %vm640_vm1, %v702_v28, %v931_v34 }
 0x414   : > { %v939_v37 = vpop.permute.xlu0 %938 }
 0x423   : > { %v935_v36 = vpop.permute.xlu1 %934 }
 0x424   : > { %v942_v38 = vsel %vm670_vm2, %v941_v35, %v935_v36 }
 0x425   : > { %v944_v39 = vsel %vm943_vm3, %v942_v38, %v939_v37 }
 0x426   : > { %1219 = vmatmul.msk.f32.vlgmr.msra.gmra.mxu1 %vm545_vm0, %v944_v39 }
 0x4a3   : > { %v973_v41 = vpop.f32.mrf.mxu1 }
 0x4a4   : > { %v974_v42 = vadd.f32 %v1352_v40, %v973_v41 }
 0x4a6   : > { %976 = vst.msk [vmem:[%s538_s20] sm:$0xff] %vm545_vm0, %v974_v42 }
 0x4a7   : > { %1636 = shalt.err (!%p1633_p8)
}
 0x4a8   : > { %1251 = dma.vmem_to_hbm [thread:$0]  (%p1839_p3), %s991_s29, 128, %s993_s6, %s978_s13  }
 0x4a9 PF: > { %s2148_s11 = sld [smem:[#allocation24_spill]]  ;;  %p2150_p9 = scmp.ge.s32.totalorder %s1695_s12, 2 }
 0x4ab   : > { %p1280_p12 = pnand %p2150_p9, %p1794_p6 }
 0x4ad   : > { %p1281_p0 = pneg %p1280_p12 }
 0x4af   : > { %s1004_s8 = sand.u32 1, %s2148_s11  }
 0x4b0   : > { %s1005_s19 = scalar_lea.sflag [#allocation4], %s1004_s8 }
 0x4b1   : > { %1678 = dma.done.wait (%p1281_p0), %s1005_s19, 128  }
 0x4b2   : > { %1680 = vsyncadd (%p1281_p0), %s1005_s19, 4294967168  ;;  %s2151_s12 = sld [smem:[#allocation27_spill]]  ;;  %s2154_s30 = smov %s1687_s10 }
 0x4b3   : > { %s2152_s5 = sld [smem:[#allocation25_spill]] }
 0x4b4   : > { %s2153_s11 = sld [smem:[#allocation29_spill]] }
 0x4b8   : > { %p30_p5 = scmp.ge.s32.totalorder %s2151_s12, 4  }
 0x4b9   : > { %s2155_s10 = smov %s2152_s5 }
 0x4ba   :  { %32 = sbr.rel (!%p30_p5) target bundleno = 17 (0x11), region = 157 }
 0x4bf   :  { %1011 = vsyncpa [#allocation3], 1 }
 0x4c0   :  { %1013 = vsyncpa [#allocation3 + $0x1], 1 }
 0x4c1   :  { %1014 = vsyncpa [#allocation6], 1 }
 0x4c2   :  { %1016 = vsyncpa [#allocation6 + $0x1], 1 }
 0x4c3   :  { %1017 = vsyncpa [#allocation9], 1 }
 0x4c4   :  { %1019 = vsyncpa [#allocation9 + $0x1], 1 }
 0x4c5   :  { %1020 = vsyncpa [#allocation12], 1 }
 0x4c6   :  { %1021 = vsyncpa [#allocation15], 1 }
 0x4c7   :  { %1022 = vsyncpa [#allocation4], 1 }
 0x4c8   :  { %1024 = vsyncpa [#allocation4 + $0x1], 1 }

</bundles_post_ra>
